<compile_context>
chip_gen: v7x
topology: tpu7x:2x2x1
jax: 0.10.0
libtpu: 0.0.40
codegen_flags: <defaults>
</compile_context>

<pallas_src>
import jax
import jax.numpy as jnp
from jax.experimental import pallas as pl
from jax.experimental.pallas import tpu as pltpu

ONEHOT_TOKENS_PER_TILE = 512   # tokens per grid step for the MXU one-hot path
DMA_TOKENS_PER_TILE = 256      # tokens per grid step for the HBM row-gather path
VOCAB_CHUNK = 256              # one-hot built in (TPT, 256) vocab slices


def _vmem_budget_bytes():
    """Usable per-core scoped-VMEM budget: physical capacity minus headroom."""
    cap = 64 << 20  # conservative default: v7x has 64 MiB per TensorCore
    try:
        cap = int(pltpu.get_tpu_info().vmem_capacity_bytes)
    except Exception:
        pass
    return max(cap - (8 << 20), 16 << 20)


def _onehot_cutoff(d_pad):
    """Largest vocab for which the one-hot MXU gather beats a row gather."""
    cutoff = 4 * d_pad
    gen_cap = 4096
    try:
        kind = jax.devices()[0].device_kind.lower()
        # v5e MXU/VPU are ~4-5x weaker -> crossover happens at a smaller V.
        if "v5 lite" in kind or "v5lite" in kind or "v5e" in kind:
            gen_cap = 1024
    except Exception:
        pass
    return min(cutoff, gen_cap)


# ----------------------------------------------------------------------------
# Path A: VMEM-resident table, vocab-chunked one-hot matmul on the MXU.
# ----------------------------------------------------------------------------
def _make_onehot_kernel(vocab, vocab_chunk):
    def kernel(ids_ref, emb_ref, out_ref, acc_ref):
        # ids_ref : VMEM (TPT, 1) int32
        # emb_ref : VMEM (V, d_pad), resident across the grid (Buffered(1))
        # out_ref : VMEM (TPT, d_pad)
        # acc_ref : VMEM (TPT, d_pad) f32 scratch
        ids = jnp.clip(ids_ref[...], 0, vocab - 1)           # clamp OOB ids
        tpt = ids.shape[0]
        vc = min(vocab_chunk, vocab)
        col = jax.lax.broadcasted_iota(jnp.int32, (tpt, vc), 1)  # hoisted iota
        acc_ref[...] = jnp.zeros_like(acc_ref)
        for start in range(0, vocab, vc):                    # static chunk loop
            size = min(vc, vocab - start)
            c = col if size == vc else col[:, :size]
            onehot = (c == (ids - start)).astype(emb_ref.dtype)
            acc_ref[...] += jnp.dot(
                onehot, emb_ref[start:start + size, :],
                preferred_element_type=jnp.float32)
        out_ref[...] = acc_ref[...].astype(out_ref.dtype)
    return kernel


# ----------------------------------------------------------------------------
# Path B: table in HBM, double-buffered per-row DMA gather.
# ----------------------------------------------------------------------------
def _embed_dma_gather_kernel(ids_ref, tbl_ref, out_ref, buf_ref, sem_ref):
    # ids_ref : SMEM (nt_pad,) int32  (scalar-prefetched token ids)
    # tbl_ref : HBM  (V, d_pad)       (memory_space=pl.ANY, never resident)
    # out_ref : VMEM (TPT, d_pad)
    # buf_ref : VMEM (2, TPT, d_pad)  row-gather landing buffers
    # sem_ref : DMA semaphores (2,)   one per buffer slot
    t = pl.program_id(0)
    nt = pl.num_programs(0)
    tpt = out_ref.shape[0]
    vocab = tbl_ref.shape[0]

    def issue_tile(tile, slot):
        base = tile * tpt

        def body(i, carry):
            row = jnp.clip(ids_ref[base + i], 0, vocab - 1)   # DMA is bounds-checked
            pltpu.make_async_copy(
                tbl_ref.at[pl.ds(row, 1)],
                buf_ref.at[slot, pl.ds(i, 1)],
                sem_ref.at[slot],
            ).start()
            return carry

        jax.lax.fori_loop(0, tpt, body, 0, unroll=4)

    # Prime the pipeline with the first tile's rows.
    @pl.when(t == 0)
    def _():
        issue_tile(0, 0)

    slot = t % 2

    # Keep the next tile's rows in flight while this tile is consumed.
    @pl.when(t + 1 < nt)
    def _():
        issue_tile(t + 1, 1 - slot)

    # Single wait for the whole tile: the slot semaphore accumulates the byte
    # count of all TPT row copies, and this descriptor carries the same size.
    pltpu.make_async_copy(buf_ref.at[slot], buf_ref.at[slot], sem_ref.at[slot]).wait()

    out_ref[...] = buf_ref[slot].astype(out_ref.dtype)


# ----------------------------------------------------------------------------
# Wrapper (forward pass of TokenEmbeddingModule).
# ----------------------------------------------------------------------------
def token_embedding(token_ids, emb_table, *, tokens_per_tile=None):
    """token_ids: (B, S) int, emb_table: (V, D) float -> (B, S, D) float."""
    B, S = token_ids.shape
    V, D = emb_table.shape
    num_tokens = B * S
    d_pad = pl.cdiv(D, 128) * 128                     # lane-dense output rows
    itemsize = jnp.dtype(emb_table.dtype).itemsize
    budget = _vmem_budget_bytes()
    table_bytes = V * d_pad * itemsize

    use_onehot = (V <= _onehot_cutoff(d_pad)) and (table_bytes <= budget // 2)

    if tokens_per_tile is None:
        tokens_per_tile = ONEHOT_TOKENS_PER_TILE if use_onehot else DMA_TOKENS_PER_TILE
    # Keep the tile a multiple of 8 sublanes and no larger than needed.
    tpt = max(8, min(tokens_per_tile, pl.cdiv(num_tokens, 8) * 8))

    nt_pad = pl.cdiv(num_tokens, tpt) * tpt
    num_tiles = nt_pad // tpt

    flat_ids = token_ids.reshape(num_tokens).astype(jnp.int32)
    if nt_pad != num_tokens:
        flat_ids = jnp.pad(flat_ids, (0, nt_pad - num_tokens))

    table = emb_table
    if d_pad != D:
        # TODO(synk): store the embedding table pre-padded to a multiple of 128
        # lanes to avoid this HBM copy on every call.
        table = jnp.pad(table, ((0, 0), (0, d_pad - D)))

    out_bytes = nt_pad * d_pad * itemsize
    ids_bytes = nt_pad * 4

    if use_onehot:
        vmem_est = (table_bytes                           # Buffered(1): 1 copy
                    + 2 * tpt * d_pad * itemsize          # double-buffered out
                    + tpt * d_pad * 4                     # f32 accumulator
                    + 2 * tpt * min(VOCAB_CHUNK, V) * 4   # one-hot temporaries
                    + 2 * tpt * 4                         # ids tiles
                    + (2 << 20))
        vmem_limit = int(min(max(vmem_est, 32 << 20), budget))
        cost = pl.CostEstimate(
            flops=int(2 * nt_pad * V * d_pad),
            transcendentals=0,
            bytes_accessed=int(out_bytes + ids_bytes + table_bytes))

        out_flat = pl.pallas_call(
            _make_onehot_kernel(V, VOCAB_CHUNK),
            out_shape=jax.ShapeDtypeStruct((nt_pad, d_pad), emb_table.dtype),
            grid=(num_tiles,),
            in_specs=[
                # NOTE: ids block is 1 lane wide; cheap in absolute terms here.
                pl.BlockSpec((tpt, 1), lambda t: (t, 0)),
                # Full table resident; constant index_map -> single buffer.
                pl.BlockSpec((V, d_pad), lambda t: (0, 0),
                             pipeline_mode=pl.Buffered(1)),
            ],
            out_specs=pl.BlockSpec((tpt, d_pad), lambda t: (t, 0)),
            scratch_shapes=[pltpu.VMEM((tpt, d_pad), jnp.float32)],
            compiler_params=pltpu.CompilerParams(
                dimension_semantics=("parallel",),       # disjoint output tiles
                vmem_limit_bytes=vmem_limit),
            cost_estimate=cost,
        )(flat_ids.reshape(nt_pad, 1), table)
    else:
        vmem_est = 4 * tpt * d_pad * itemsize + (2 << 20)   # gather buf + out bufs
        vmem_limit = int(min(max(vmem_est, 32 << 20), budget))
        cost = pl.CostEstimate(
            flops=0,
            transcendentals=0,
            bytes_accessed=int(2 * out_bytes + ids_bytes))

        grid_spec = pltpu.PrefetchScalarGridSpec(
            num_scalar_prefetch=1,
            grid=(num_tiles,),
            in_specs=[pl.BlockSpec(memory_space=pl.ANY)],    # table stays in HBM
            out_specs=pl.BlockSpec((tpt, d_pad), lambda t, ids: (t, 0)),
            scratch_shapes=[
                pltpu.VMEM((2, tpt, d_pad), table.dtype),
                pltpu.SemaphoreType.DMA((2,)),
            ])
        out_flat = pl.pallas_call(
            _embed_dma_gather_kernel,
            out_shape=jax.ShapeDtypeStruct((nt_pad, d_pad), emb_table.dtype),
            grid_spec=grid_spec,
            compiler_params=pltpu.CompilerParams(
                # The DMA double buffer carries state across grid steps, so the
                # token axis must run sequentially on one core.
                # TODO(synk): add a leading core axis for v7x megacore sharding.
                dimension_semantics=("arbitrary",),
                vmem_limit_bytes=vmem_limit),
            cost_estimate=cost,
        )(flat_ids, table)

    return out_flat[:num_tokens, :D].reshape(B, S, D)


if __name__ == "__main__":
    key = jax.random.PRNGKey(0)

    # --- Config 1: small vocab -> VMEM-resident one-hot (MXU) path. ---------
    vocab, dim, batch, seq = 64, 128, 2, 8
    key, k_emb, k_ids = jax.random.split(key, 3)
    emb = jax.random.normal(k_emb, (vocab, dim), jnp.float32)   # nn.Embedding: N(0,1)
    ids = jax.random.randint(k_ids, (batch, seq), 0, vocab, jnp.int32)
    out = jax.block_until_ready(token_embedding(ids, emb))
    ref = jnp.take(emb, ids, axis=0)
    assert out.shape == (batch, seq, dim)
    assert jnp.allclose(out, ref, atol=1e-5, rtol=1e-5), "one-hot path mismatch"

    # --- Config 2: larger vocab -> HBM row-gather DMA path (multi-tile). ----
    vocab2, dim2, batch2, seq2 = 1024, 128, 2, 384
    key, k_emb2, k_ids2 = jax.random.split(key, 3)
    emb2 = jax.random.normal(k_emb2, (vocab2, dim2), jnp.float32)
    ids2 = jax.random.randint(k_ids2, (batch2, seq2), 0, vocab2, jnp.int32)
    out2 = jax.block_until_ready(token_embedding(ids2, emb2))
    ref2 = jnp.take(emb2, ids2, axis=0)
    assert out2.shape == (batch2, seq2, dim2)
    assert jnp.allclose(out2, ref2), "dma-gather path mismatch"

    print("KERNEL_OK")
</pallas_src>

<mosaic_0001>
module attributes {stable_mosaic.version = 11 : i64} {
  func.func @kernel(%arg0: i32, %arg1: memref<16x1xi32, #tpu.memory_space<vmem>>, %arg2: memref<64x128xf32, #tpu.memory_space<vmem>>, %arg3: memref<16x128xf32, #tpu.memory_space<vmem>>, %arg4: memref<16x128xf32, #tpu.memory_space<vmem>>) attributes {dimension_semantics = [#tpu.dimension_semantics<parallel>], iteration_bounds = array<i64: 1>, scalar_prefetch = 0 : i64, scratch_operands = 1 : i64, tpu.core_type = #tpu.core_type<tc>, window_params = [{transform_indices = @transform_0, window_bounds = array<i64: 16, 1>}, {pipeline_mode = #tpu.pipeline_mode<synchronous>, transform_indices = @transform_1, window_bounds = array<i64: 64, 128>}, {transform_indices = @transform_2, window_bounds = array<i64: 16, 128>}]} {
    %c0 = arith.constant 0 : index
    %c0_0 = arith.constant 0 : index
    %0 = vector.load %arg1[%c0, %c0_0] : memref<16x1xi32, #tpu.memory_space<vmem>>, vector<16x1xi32>
    %c0_i32 = arith.constant 0 : i32
    %c63_i32 = arith.constant 63 : i32
    %1 = vector.broadcast %c0_i32 : i32 to vector<16x1xi32>
    %2 = arith.maxsi %1, %0 : vector<16x1xi32>
    %3 = vector.broadcast %c63_i32 : i32 to vector<16x1xi32>
    %4 = arith.minsi %3, %2 : vector<16x1xi32>
    %5 = tpu.iota {dimensions = array<i32: 1>} : vector<16x64xi32>
    %cst = arith.constant 0.000000e+00 : f32
    %6 = vector.broadcast %cst : f32 to vector<16x128xf32>
    %c0_1 = arith.constant 0 : index
    %c0_2 = arith.constant 0 : index
    %7 = vector.load %arg4[%c0_1, %c0_2] : memref<16x128xf32, #tpu.memory_space<vmem>>, vector<16x128xf32>
    tpu.vector_store %arg4[%c0_1, %c0_2], %6 {strides = array<i32>} : memref<16x128xf32, #tpu.memory_space<vmem>>, vector<16x128xf32>,
    %c0_i32_3 = arith.constant 0 : i32
    %8 = vector.broadcast %c0_i32_3 : i32 to vector<16x1xi32>
    %9 = arith.subi %4, %8 : vector<16x1xi32>
    %10 = vector.broadcast %9 : vector<16x1xi32> to vector<16x64xi32>
    %11 = arith.cmpi eq, %5, %10 : vector<16x64xi32>
    %12 = arith.extui %11 : vector<16x64xi1> to vector<16x64xi32>
    %13 = arith.sitofp %12 : vector<16x64xi32> to vector<16x64xf32>
    %c0_4 = arith.constant 0 : index
    %c0_5 = arith.constant 0 : index
    %14 = vector.load %arg4[%c0_4, %c0_5] : memref<16x128xf32, #tpu.memory_space<vmem>>, vector<16x128xf32>
    %c0_6 = arith.constant 0 : index
    %c0_7 = arith.constant 0 : index
    %15 = vector.load %arg2[%c0_6, %c0_7] : memref<64x128xf32, #tpu.memory_space<vmem>>, vector<64x128xf32>
    %cst_8 = arith.constant dense<0.000000e+00> : vector<16x128xf32>
    %16 = tpu.matmul %13, %15, %cst_8 {dimension_numbers = #tpu.dot_dimension_numbers<[1], [0], [0], [1], [0, 0, 1, 1], [], []>} : vector<16x64xf32>, vector<64x128xf32>, vector<16x128xf32> -> vector<16x128xf32>
    %17 = arith.addf %14, %16 : vector<16x128xf32>
    %c0_9 = arith.constant 0 : index
    %c0_10 = arith.constant 0 : index
    %18 = vector.load %arg4[%c0_9, %c0_10] : memref<16x128xf32, #tpu.memory_space<vmem>>, vector<16x128xf32>
    tpu.vector_store %arg4[%c0_9, %c0_10], %17 {strides = array<i32>} : memref<16x128xf32, #tpu.memory_space<vmem>>, vector<16x128xf32>,
    %c0_11 = arith.constant 0 : index
    %c0_12 = arith.constant 0 : index
    %19 = vector.load %arg4[%c0_11, %c0_12] : memref<16x128xf32, #tpu.memory_space<vmem>>, vector<16x128xf32>
    %c0_13 = arith.constant 0 : index
    %c0_14 = arith.constant 0 : index
    %20 = vector.load %arg3[%c0_13, %c0_14] : memref<16x128xf32, #tpu.memory_space<vmem>>, vector<16x128xf32>
    tpu.vector_store %arg3[%c0_13, %c0_14], %19 {strides = array<i32>} : memref<16x128xf32, #tpu.memory_space<vmem>>, vector<16x128xf32>,
    return
  }
  func.func @transform_0(%arg0: i32) -> (i32, i32) {
    %c0_i32 = arith.constant 0 : i32
    %c0_i32_0 = arith.constant 0 : i32
    return %arg0, %c0_i32 : i32, i32
  }
  func.func @transform_1(%arg0: i32) -> (i32, i32) {
    %c0_i32 = arith.constant 0 : i32
    %c0_i32_0 = arith.constant 0 : i32
    %c0_i32_1 = arith.constant 0 : i32
    return %c0_i32, %c0_i32_0 : i32, i32
  }
  func.func @transform_2(%arg0: i32) -> (i32, i32) {
    %c0_i32 = arith.constant 0 : i32
    %c0_i32_0 = arith.constant 0 : i32
    return %arg0, %c0_i32 : i32, i32
  }
}

</mosaic_0001>

<bundles_post_ra>
// kernel: tpu_custom_call.1
= control target key start
LH: loop header
LB: loop body
LE: loop exit
PB: predicated region body
PF: predicated region fallthrough
CT: control target
= control target key end

     0   :  { %7 = vsyncpa [#allocation4], 0  ;;  %s330_s0 = inlined_call_operand.vmem [shape: s32[16,1], index: 0, kind: input, shape index: {}]   ;;  %s331_s1 = inlined_call_operand.hbm [shape: f32[64,128], index: 1, kind: input, shape index: {}]   ;;  %s332_s2 = inlined_call_operand.hbm [shape: f32[16,128], index: 2, kind: output, shape index: {}]  }
   0x1   :  { %8 = vsyncpa [#allocation5], 0  ;;  %s273_s9 = smov [#allocation3]   ;;  %s225_s13 = scalar_lea.hbm %s331_s1, 1024 }
   0x2   :  { %s16_s10 = sshll.u32 %s273_s9, 4  ;;  %p226_p0 = scmp.ne.s32.totalorder %s331_s1, %s225_s13  ;;  %s17_s10 = int_to_ptr.vmem [resolvable:$true] %s16_s10 }
   0x3   :  { %p229_p1 = scmp.lt.u32.totalorder %s225_s13, %s331_s1 }
   0x5   :  { %p231_p2 = pnand %p229_p1, %p226_p0 }
   0x7   :  { %234 = shalt.err (!%p231_p2)
}
   0x8   :  { %s235_s18 = scalar_lea.vmem %s17_s10, 1024  ;;  %p240_p4 = scmp.lt.s32.totalorder %s17_s10, %s17_s10 }
   0x9   :  { %p236_p3 = scmp.ne.s32.totalorder %s17_s10, %s235_s18  ;;  %p241_p5 = scmp.lt.s32.totalorder %s235_s18, %s235_s18 }
   0xb   :  { %p242_p6 = por %p241_p5, %p240_p4 }
   0xd   :  { %p243_p7 = pnand %p242_p6, %p236_p3 }
   0xf   :  { %246 = shalt.err (!%p243_p7)
}
  0x10   :  { %s274_s19 = smov 128   ;;  %s275_s20 = smov 8  }
  0x11   :  { %22 = dma.hbm_to_vmem [thread:$0]  %s331_s1, 1024, %s17_s10, [#allocation4], %s274_s19, %s274_s19, %s275_s20  }
  0x12   :  { %269 = dma.done.wait [#allocation4], 1024  }
  0x13   :  { %270 = vsyncadd [#allocation4], 4294966272  ;;  %v276_v0 = vmov 0   ;;  %v26_v1 = vld [vmem:[%s330_s0] sm:$0xff]  ;;  %v27_v2 = vld [vmem:[%s330_s0 + $0x8] sm:$0xff]  ;;  %v36_v19 = vlaneseq  ;;  %vm62_vm4 = vcmask 523264  }
  0x14   :  { %224 = vset.pattern.permute.xlu0 %v276_v0  ;;  %v54_v3 = vld [vmem:[#allocation3] sm:$0xff]  ;;  %vm28_vm0 = vcmp.gt.s32.totalorder %v26_v1, 0  ;;  %vm30_vm1 = vcmp.gt.s32.totalorder %v27_v2, 0  ;;  %v55_v4 = vld [vmem:[#allocation3 + $0x8] sm:$0xff]  ;;  %v56_v5 = vld [vmem:[#allocation3 + $0x10] sm:$0xff]  ;;  %v277_v22 = vmov 0.0  }
  0x15   :  { %v57_v6 = vld [vmem:[#allocation3 + $0x18] sm:$0xff]  ;;  %v29_v7 = vsel %vm28_vm0, %v26_v1, 0  ;;  %v31_v8 = vsel %vm30_vm1, %v27_v2, 0  ;;  %v202_v9 = vpack.c.bf16 %v55_v4, %v54_v3  ;;  %v58_v11 = vld [vmem:[#allocation3 + $0x20] sm:$0xff]  ;;  %v59_v12 = vld [vmem:[#allocation3 + $0x28] sm:$0xff]  ;;  %v37_v20 = vand.u32 127, %v36_v19 }
  0x16   :  { %v206_v10 = vpack.c.bf16 %v57_v6, %v56_v5  ;;  %vm32_vm2 = vcmp.lt.s32.totalorder %v29_v7, 63  ;;  %vm34_vm3 = vcmp.lt.s32.totalorder %v31_v8, 63  ;;  %v210_v15 = vpack.c.bf16 %v59_v12, %v58_v11  ;;  %v60_v16 = vld [vmem:[#allocation3 + $0x30] sm:$0xff]  ;;  %v61_v17 = vld [vmem:[#allocation3 + $0x38] sm:$0xff]  ;;  %s278_s0 = smov [#allocation6]  }
  0x17   :  { %v33_v13 = vsel %vm32_vm2, %v29_v7, 63  ;;  %203 = vmatprep.subr.bf16.mxu0 %v202_v9  ;;  %v35_v14 = vsel %vm34_vm3, %v31_v8, 63  ;;  %v214_v18 = vpack.c.bf16 %v61_v17, %v60_v16  ;;  %s157_s1 = sshll.u32 %s278_s0, 4  ;;  %s158_s1 = int_to_ptr.vmem [resolvable:$true] %s157_s1 }
  0x18   :  { %41 = vperm.xlu0 %224, %v33_v13   ;;  %205 = vmatpush3.bf16.msra.mxu0 %v202_v9  ;;  %s247_s27 = scalar_lea.vmem %s158_s1, 256  ;;  %p252_p9 = scmp.lt.s32.totalorder %s158_s1, %s158_s1 }
  0x19   :  { %207 = vmatprep.subr.bf16.mxu0 %v206_v10  ;;  %p248_p8 = scmp.ne.s32.totalorder %s158_s1, %s247_s27  ;;  %p253_p10 = scmp.lt.s32.totalorder %s247_s27, %s247_s27 }
  0x1b   :  { %p254_p11 = por %p253_p10, %p252_p9 }
  0x1c   :  { %44 = vperm.xlu0 %224, %v35_v14   ;;  %209 = vmatpush3.bf16.msra.mxu0 %v206_v10 }
  0x1d   :  { %211 = vmatprep.subr.bf16.mxu0 %v210_v15  ;;  %p255_p12 = pnand %p254_p11, %p248_p8 }
  0x20   :  { %213 = vmatpush3.bf16.msra.mxu0 %v210_v15 }
  0x21   :  { %215 = vmatprep.subr.bf16.mxu0 %v214_v18 }
  0x24   :  { %217 = vmatpush3.bf16.msra.mxu0 %v214_v18 }
  0x97   :  { %v42_v21 = vpop.permute.xlu0 %41 }
  0x98   :  { %vm46_vm5 = vcmp.eq.s32.totalorder %v37_v20, %v42_v21 }
  0x99   :  { %v169_v23 = vsel %vm46_vm5, 1.0, %v277_v22 }
  0x9a   :  { %199 = vmatprep.mubr.msk.f32.mxu0 %vm62_vm4, %v169_v23 }
  0x9b   :  { %v45_v24 = vpop.permute.xlu0 %44 }
  0x9c   :  { %vm47_vm6 = vcmp.eq.s32.totalorder %v37_v20, %v45_v24 }
  0x9d   :  { %v170_v25 = vsel %vm47_vm6, 1.0, %v277_v22 }
  0x9e   :  { %200 = vmatmul.mubr.msk.f32.vlgmr.msra.gmra.mrb[0].mxu0 %vm62_vm4, %v170_v25 }
 0x171   :  { %v201_v26 = vpop.f32.mrb[0].mxu0 }
 0x172   :  { %151 = vst [vmem:[#allocation6 + $0x8] sm:$0xff] %v201_v26  ;;  %v135_v27 = vpop.f32.mrb[1].mxu0 }
 0x173   :  { %150 = vst [vmem:[#allocation6] sm:$0xff] %v135_v27 }
 0x174   :  { %258 = shalt.err (!%p255_p12)
}
 0x175   :  { %s259_s30 = scalar_lea.hbm %s332_s2, 256 }
 0x176   :  { %p260_p13 = scmp.ne.s32.totalorder %s332_s2, %s259_s30  ;;  %p263_p0 = scmp.lt.u32.totalorder %s259_s30, %s332_s2 }
 0x178   :  { %p265_p1 = pnand %p263_p0, %p260_p13 }
 0x17a   :  { %268 = shalt.err (!%p265_p1)
}
 0x17b   :  { %163 = dma.vmem_to_hbm [thread:$0]  %s158_s1, 256, %s332_s2, [#allocation5], %s274_s19, %s274_s19, %s275_s20  }
 0x17c   :  { %271 = dma.done.wait [#allocation5], 256  }
 0x17d   :  { %272 = vsyncadd [#allocation5], 4294967040 }
 0x17e   :  { %167 = vsyncpa [#allocation4], 1 }
 0x17f   :  { %168 = vsyncpa [#allocation5], 1 }

</bundles_post_ra>
